<compile_context>
chip_gen: v7x
topology: tpu7x:2x2x1
jax: 0.10.0
libtpu: 0.0.40
codegen_flags: <defaults>
</compile_context>

<pallas_src>
import functools

import jax
import jax.numpy as jnp
from jax.experimental import pallas as pl
from jax.experimental.pallas import tpu as pltpu

_DEFAULT_TILE_ROWS = 512
# Target HBM bytes per grid step (per input buffer).  Big enough that the
# ~0.35 us fixed per-step overhead stays <~10% of the DMA window even at
# v7x's ~3.2 TB/s; small enough that double-buffering fits comfortably under
# v7x's 64 MiB physical VMEM (and trivially under v5e/v6e's 128 MiB).
_TARGET_TILE_BYTES = 8 * 1024 * 1024
_LANE = 128
_GROUP = 4  # lane-chunks summed in registers before each accumulator update


def _round_up(v: int, m: int) -> int:
    return ((v + m - 1) // m) * m


def _mean_channel_kernel(x_ref, o_ref, acc_ref, *, tile_len, last_valid, length):
    """Row-wise mean over the trailing (L) axis.

    x_ref:   (TR, TL)  input tile in VMEM
    o_ref:   (TR, 1)   output tile (written only at the final reduction step)
    acc_ref: (TR, 128) lane-dense f32 accumulator, resident across the L axis
    """
    k = pl.program_id(1)
    last = pl.num_programs(1) - 1

    @pl.when(k == 0)
    def _():
        acc_ref[...] = jnp.zeros_like(acc_ref)

    def accumulate(ncols):
        # Sum the first `ncols` columns of the tile into the (TR, 128)
        # accumulator using 128-lane chunks: VPU adds only, no per-step XLU
        # cross-lane reduce and no iota/mask work.  Small register trees
        # (_GROUP chunks) cut accumulator VMEM round-trips by ~4x.
        nfull = ncols // _LANE
        rem = ncols - nfull * _LANE
        j = 0
        while j < nfull:
            g = min(_GROUP, nfull - j)
            s = x_ref[:, j * _LANE:(j + 1) * _LANE].astype(jnp.float32)
            for jj in range(j + 1, j + g):
                s = s + x_ref[:, jj * _LANE:(jj + 1) * _LANE].astype(jnp.float32)
            acc_ref[...] += s
            j += g
        if rem > 0:
            lo = nfull * _LANE
            acc_ref[:, :rem] += x_ref[:, lo:lo + rem].astype(jnp.float32)

    if last_valid == tile_len:
        # L divides evenly into tiles (or there is a single full tile):
        # every step takes the clean, mask-free path.
        accumulate(tile_len)
    else:
        # Only the final L tile is ragged; all other steps stay mask-free.
        @pl.when(k != last)
        def _():
            accumulate(tile_len)

        @pl.when(k == last)
        def _():
            accumulate(last_valid)

    @pl.when(k == last)
    def _():
        # One XLU cross-lane reduce + one multiply by the constant 1/L.
        total = jnp.sum(acc_ref[...], axis=1, keepdims=True)
        o_ref[...] = (total * (1.0 / length)).astype(o_ref.dtype)


def _vmem_limit_bytes() -> int:
    # 48 MiB is safe on v5e/v6e (128 MiB physical) and v7x (64 MiB physical);
    # clamp further if the runtime reports a smaller VMEM capacity.
    limit = 48 * 1024 * 1024
    try:
        cap = int(pltpu.get_tpu_info().vmem_capacity_bytes)
        limit = min(limit, cap * 3 // 4)
    except Exception:
        pass
    return limit


def mean_channel(x: jax.Array, *, tile_rows=None, tile_len=None) -> jax.Array:
    """Pallas equivalent of torch.mean(x, 2) for a 3-D (N, C, L) input."""
    N, C, L = x.shape
    nc = N * C
    x2 = x.reshape(nc, L)  # free view for contiguous NCL
    itemsize = jnp.dtype(x.dtype).itemsize

    if tile_rows is None:
        tile_rows = _DEFAULT_TILE_ROWS
    assert tile_rows % 8 == 0, "tile_rows must be a multiple of 8"

    if tile_len is None:
        # dtype-aware: keep per-step HBM bytes ~= _TARGET_TILE_BYTES
        # (f32 -> 4096, bf16 -> 8192, int8/fp8 -> 16384 at 512 rows).
        tile_len = max(_LANE,
                       (_TARGET_TILE_BYTES // (tile_rows * itemsize)) // _LANE * _LANE)
    assert tile_len % _LANE == 0, "tile_len must be a multiple of 128"

    # Row tile: full extent for tiny inputs; otherwise a multiple of 8 chosen
    # so there are >= 2 row blocks, letting the "parallel" axis feed both
    # TensorCores on v7x (no effect on single-TC v5e/v6e).
    if nc <= 8:
        tr = nc
    elif nc <= tile_rows:
        tr = min(tile_rows, _round_up(max(nc // 2, 8), 8))
    else:
        tr = tile_rows

    # L tile: full extent (always legal) or a 128-aligned tile.
    tl = L if L <= tile_len else tile_len

    grid_r = pl.cdiv(nc, tr)
    grid_l = pl.cdiv(L, tl)
    last_valid = L - (grid_l - 1) * tl  # valid columns in the final L tile

    kernel = functools.partial(_mean_channel_kernel,
                               tile_len=tl, last_valid=last_valid, length=L)

    out = pl.pallas_call(
        kernel,
        out_shape=jax.ShapeDtypeStruct((nc, 1), x.dtype),
        grid_spec=pltpu.PrefetchScalarGridSpec(
            num_scalar_prefetch=0,
            grid=(grid_r, grid_l),
            in_specs=[pl.BlockSpec((tr, tl), lambda r, k: (r, k))],
            out_specs=pl.BlockSpec((tr, 1), lambda r, k: (r, 0)),
            scratch_shapes=[pltpu.VMEM((tr, _LANE), jnp.float32)],
        ),
        compiler_params=pltpu.CompilerParams(
            # rows: independent (megacore-shardable on v7x); L: reduction axis,
            # kept last so the output block stays resident across it.
            dimension_semantics=("parallel", "arbitrary"),
            vmem_limit_bytes=_vmem_limit_bytes(),
        ),
    )(x2)

    return out.reshape(N, C)


if __name__ == "__main__":
    root = jax.random.PRNGKey(0)
    k0, k1, k2 = jax.random.split(root, 3)

    # Small shape consistent with the module's (N, C, L) usage.
    x = jax.random.normal(k0, (2, 4, 16), dtype=jnp.float32)
    out = jax.block_until_ready(mean_channel(x))
    ref = jnp.mean(x, axis=2)
    assert out.shape == (2, 4), out.shape
    assert jnp.allclose(out, ref, atol=1e-5, rtol=1e-5), (out, ref)

    # Tiled multi-step reduction path: ragged last L tile + multiple row blocks.
    x2 = jax.random.normal(k1, (2, 16, 300), dtype=jnp.float32)
    out2 = jax.block_until_ready(mean_channel(x2, tile_rows=8, tile_len=128))
    ref2 = jnp.mean(x2, axis=2)
    assert out2.shape == (2, 16), out2.shape
    assert jnp.allclose(out2, ref2, atol=1e-5, rtol=1e-5), (out2, ref2)

    # bf16 input: dtype-aware tile sizing, ragged row block, remainder lanes.
    x3 = jax.random.normal(k2, (3, 5, 700), dtype=jnp.float32).astype(jnp.bfloat16)
    out3 = jax.block_until_ready(mean_channel(x3))
    ref3 = jnp.mean(x3.astype(jnp.float32), axis=2)
    assert out3.shape == (3, 5), out3.shape
    assert jnp.allclose(out3.astype(jnp.float32), ref3, atol=1e-2, rtol=1e-2), (out3, ref3)

    print("KERNEL_OK")
</pallas_src>

<mosaic_0001>
module attributes {stable_mosaic.version = 11 : i64} {
  func.func @_mean_channel_kernel(%arg0: i32, %arg1: i32, %arg2: memref<8x16xf32, #tpu.memory_space<vmem>>, %arg3: memref<8x1xf32, #tpu.memory_space<vmem>>, %arg4: memref<8x128xf32, #tpu.memory_space<vmem>>) attributes {dimension_semantics = [#tpu.dimension_semantics<parallel>, #tpu.dimension_semantics<arbitrary>], iteration_bounds = array<i64: 1, 1>, scalar_prefetch = 0 : i64, scratch_operands = 1 : i64, tpu.core_type = #tpu.core_type<tc>, window_params = [{transform_indices = @transform_0, window_bounds = array<i64: 8, 16>}, {transform_indices = @transform_1, window_bounds = array<i64: 8, 1>}]} {
    %c0_i32 = arith.constant 0 : i32
    %0 = arith.cmpi eq, %arg1, %c0_i32 : i32
    %1 = arith.extui %0 : i1 to i32
    %c0_i32_0 = arith.constant 0 : i32
    %2 = arith.cmpi ne, %1, %c0_i32_0 : i32
    scf.if %2 {
      %cst = arith.constant 0.000000e+00 : f32
      %10 = vector.broadcast %cst : f32 to vector<8x128xf32>
      %c0_8 = arith.constant 0 : index
      %c0_9 = arith.constant 0 : index
      %11 = vector.load %arg4[%c0_8, %c0_9] : memref<8x128xf32, #tpu.memory_space<vmem>>, vector<8x128xf32>
      tpu.vector_store %arg4[%c0_8, %c0_9], %10 {strides = array<i32>} : memref<8x128xf32, #tpu.memory_space<vmem>>, vector<8x128xf32>,
    } else {
    }
    %c0 = arith.constant 0 : index
    %c0_1 = arith.constant 0 : index
    %3 = vector.load %arg4[%c0, %c0_1] : memref<8x128xf32, #tpu.memory_space<vmem>>, vector<8x16xf32>
    %c0_2 = arith.constant 0 : index
    %c0_3 = arith.constant 0 : index
    %4 = vector.load %arg2[%c0_2, %c0_3] : memref<8x16xf32, #tpu.memory_space<vmem>>, vector<8x16xf32>
    %5 = arith.addf %3, %4 : vector<8x16xf32>
    %c0_4 = arith.constant 0 : index
    %c0_5 = arith.constant 0 : index
    %6 = vector.load %arg4[%c0_4, %c0_5] : memref<8x128xf32, #tpu.memory_space<vmem>>, vector<8x16xf32>
    tpu.vector_store %arg4[%c0_4, %c0_5], %5 {strides = array<i32>} : memref<8x128xf32, #tpu.memory_space<vmem>>, vector<8x16xf32>,
    %c0_i32_6 = arith.constant 0 : i32
    %7 = arith.cmpi eq, %arg1, %c0_i32_6 : i32
    %8 = arith.extui %7 : i1 to i32
    %c0_i32_7 = arith.constant 0 : i32
    %9 = arith.cmpi ne, %8, %c0_i32_7 : i32
    scf.if %9 {
      %c0_8 = arith.constant 0 : index
      %c0_9 = arith.constant 0 : index
      %10 = vector.load %arg4[%c0_8, %c0_9] : memref<8x128xf32, #tpu.memory_space<vmem>>, vector<8x128xf32>
      %cst = arith.constant dense<0.000000e+00> : vector<8xf32>
      %11 = vector.multi_reduction <add>, %10, %cst [1] : vector<8x128xf32> to vector<8xf32>
      %12 = vector.shape_cast %11 : vector<8xf32> to vector<8x1xf32>
      %cst_10 = arith.constant 6.250000e-02 : f32
      %13 = vector.broadcast %cst_10 : f32 to vector<8x1xf32>
      %14 = arith.mulf %12, %13 : vector<8x1xf32>
      %c0_11 = arith.constant 0 : index
      %c0_12 = arith.constant 0 : index
      %15 = vector.load %arg3[%c0_11, %c0_12] : memref<8x1xf32, #tpu.memory_space<vmem>>, vector<8x1xf32>
      tpu.vector_store %arg3[%c0_11, %c0_12], %14 {strides = array<i32>} : memref<8x1xf32, #tpu.memory_space<vmem>>, vector<8x1xf32>,
    } else {
    }
    return
  }
  func.func @transform_0(%arg0: i32, %arg1: i32) -> (i32, i32) {
    %c0_i32 = arith.constant 0 : i32
    return %arg0, %arg1 : i32, i32
  }
  func.func @transform_1(%arg0: i32, %arg1: i32) -> (i32, i32) {
    %c0_i32 = arith.constant 0 : i32
    %c0_i32_0 = arith.constant 0 : i32
    return %arg0, %c0_i32 : i32, i32
  }
}

</mosaic_0001>

<bundles_post_ra>
// kernel: tpu_custom_call.1
= control target key start
LH: loop header
LB: loop body
LE: loop exit
PB: predicated region body
PF: predicated region fallthrough
CT: control target
= control target key end

     0   :  { %6 = vsyncpa [#allocation4], 0  ;;  %s70_s6 = smov [#allocation3]   ;;  %s97_s0 = inlined_call_operand.hbm [shape: f32[8,16], index: 0, kind: input, shape index: {}]   ;;  %s98_s1 = inlined_call_operand.vmem [shape: f32[8,1], index: 1, kind: output, shape index: {}]  }
   0x1   :  { %s13_s7 = sshll.u32 %s70_s6, 4  ;;  %s46_s10 = scalar_lea.hbm %s97_s0, 128  ;;  %s14_s7 = int_to_ptr.vmem [resolvable:$true] %s13_s7 }
   0x2   :  { %p47_p0 = scmp.ne.s32.totalorder %s97_s0, %s46_s10  ;;  %p50_p1 = scmp.lt.u32.totalorder %s46_s10, %s97_s0 }
   0x4   :  { %p52_p2 = pnand %p50_p1, %p47_p0 }
   0x6   :  { %55 = shalt.err (!%p52_p2)
}
   0x7   :  { %s56_s15 = scalar_lea.vmem %s14_s7, 128  ;;  %p61_p4 = scmp.lt.s32.totalorder %s14_s7, %s14_s7 }
   0x8   :  { %p57_p3 = scmp.ne.s32.totalorder %s14_s7, %s56_s15  ;;  %p62_p5 = scmp.lt.s32.totalorder %s56_s15, %s56_s15 }
   0xa   :  { %p63_p6 = por %p62_p5, %p61_p4 }
   0xc   :  { %p64_p7 = pnand %p63_p6, %p57_p3 }
   0xe   :  { %67 = shalt.err (!%p64_p7)
}
   0xf   :  { %16 = dma.hbm_to_vmem [thread:$0]  %s97_s0, 128, %s14_s7, [#allocation4]  }
  0x10   :  { %68 = dma.done.wait [#allocation4], 128  }
  0x11   :  { %69 = vsyncadd [#allocation4], 4294967168  ;;  %v71_v0 = vmov 0.0   ;;  %v26_v1 = vld [vmem:[#allocation3] sm:$0xff]  ;;  %vm28_vm0 = vcmask 130048   ;;  %vm37_vm1 = vcmask 7168  }
  0x12   :  { %24 = vst [vmem:[#allocation2] sm:$0xff] %v71_v0 }
  0x13   :  { %29 = vst.msk [vmem:[#allocation2] sm:$0xff] %vm28_vm0, %v26_v1 }
  0x1a   :  { %v33_v2 = vld [vmem:[#allocation2] sm:$0xff] }
  0x1b   :  { %34 = vadd.xlane.f32.xlu0 %v33_v2 }
  0xa8   :  { %v35_v3 = vpop.xlane.xlu0 %34 }
  0xa9   :  { %v36_v4 = vmul.f32 0.0625, %v35_v3 }
  0xab   :  { %38 = vst.msk [vmem:[%s98_s1] sm:$0xff] %vm37_vm1, %v36_v4 }
  0xac   :  { %43 = vsyncpa [#allocation4], 1 }

</bundles_post_ra>
